<compile_context>
chip_gen: v5e
topology: v5e:2x2
jax: 0.10.0
libtpu: 0.0.40
codegen_flags: <defaults>
</compile_context>

<pallas_src>
import functools

import jax
import jax.numpy as jnp
from jax.experimental import pallas as pl
from jax.experimental.pallas import tpu as pltpu


LANE = 128
VMEM_LIMIT_BYTES = 48 * 1024 * 1024       # safe on v5e/v6e (128 MiB) and v7x (64 MiB)
MEAN_TILE_BYTES = 8 * 1024 * 1024         # per-buffer input tile target (double-buffered)


def _round_up(x: int, m: int) -> int:
    return ((x + m - 1) // m) * m


# ---------------------------------------------------------------------------
# Kernels
# ---------------------------------------------------------------------------
def _cls_kernel(cls_ref, w_ref, b_ref, logits_ref):
    # cls_ref    : [TB, H]    (the s=0 token rows; native dtype)
    # w_ref      : [H, Lp]    (lane-padded classifier weight)
    # b_ref      : [1, Lp]
    # logits_ref : [TB, Lp]
    logits = jnp.dot(cls_ref[...], w_ref[...],
                     preferred_element_type=jnp.float32)     # MXU, f32 accum
    logits = logits + b_ref[...].astype(jnp.float32)
    logits_ref[...] = logits.astype(logits_ref.dtype)


def _mean_kernel(hidden_ref, w_ref, b_ref, pooled_ref, logits_ref, acc_ref,
                 *, seq_len: int, block_seq: int, mask_seq: bool):
    # hidden_ref : [TB, TS, H]  current seq tile (tail rows may be garbage ->
    #                           masked below when mask_seq is True)
    # acc_ref    : [TB, H] f32  running sum over seq tiles
    s = pl.program_id(1)

    @pl.when(s == 0)
    def _():
        acc_ref[...] = jnp.zeros_like(acc_ref)

    # Per-tile cast + VPU partial sum; overlaps with DMA of the next tile.
    x = hidden_ref[...].astype(jnp.float32)
    if mask_seq:
        # Zero out rows past the true sequence length (boundary-block garbage).
        row = jax.lax.broadcasted_iota(jnp.int32, (1, block_seq, 1), 1) + s * block_seq
        x = jnp.where(row < seq_len, x, 0.0)
    acc_ref[...] += jnp.sum(x, axis=1)

    @pl.when(s == pl.num_programs(1) - 1)
    def _():
        pooled = acc_ref[...] * (1.0 / seq_len)              # divide by true S
        pooled_ref[...] = pooled.astype(pooled_ref.dtype)
        logits = jnp.dot(pooled.astype(w_ref.dtype), w_ref[...],
                         preferred_element_type=jnp.float32)
        logits = logits + b_ref[...].astype(jnp.float32)
        logits_ref[...] = logits.astype(logits_ref.dtype)


# ---------------------------------------------------------------------------
# Wrapper
# ---------------------------------------------------------------------------
def pooled_lm_forward(last_hidden, w, b, *, pooling="cls"):
    """last_hidden: [B, S, H], w: [H, L] (pre-transposed Linear weight), b: [L]
    -> {'hidden': [B, H], 'logits': [B, L]}"""
    B, S, H = last_hidden.shape
    H_w, L = w.shape
    assert H_w == H

    L_pad = _round_up(L, LANE)                   # lane-dense logits slab
    pooled_dtype = last_hidden.dtype
    # Keep classifier precision: logits in the promoted activation/weight dtype.
    logits_dtype = jnp.result_type(last_hidden.dtype, w.dtype)

    # Zero-pad classifier params to the lane-dense width (sliced off below).
    w_p = jnp.zeros((H, L_pad), w.dtype).at[:, :L].set(w)
    b_p = jnp.zeros((1, L_pad), b.dtype).at[0, :L].set(b.reshape(L))

    if pooling == "cls":
        # Only the s=0 row is ever needed: slice before the pallas_call so HBM
        # traffic is ~B*H instead of B*S*H. The pooled output IS this slice, so
        # no pass-through copy goes through the kernel.
        cls_tok = last_hidden[:, 0, :]                       # [B, H]
        TB = min(_round_up(B, 8), 256)                       # fill MXU rows
        nb = pl.cdiv(B, TB)                                  # == 1 for B <= 256
        B_out = nb * TB

        logits_p = pl.pallas_call(
            _cls_kernel,
            out_shape=jax.ShapeDtypeStruct((B_out, L_pad), logits_dtype),
            grid_spec=pltpu.PrefetchScalarGridSpec(
                num_scalar_prefetch=0,
                grid=(nb,),
                in_specs=[
                    pl.BlockSpec((TB, H), lambda i: (i, 0)),
                    pl.BlockSpec((H, L_pad), lambda i: (0, 0)),
                    pl.BlockSpec((1, L_pad), lambda i: (0, 0)),
                ],
                out_specs=pl.BlockSpec((TB, L_pad), lambda i: (i, 0)),
            ),
            compiler_params=pltpu.CompilerParams(
                dimension_semantics=("parallel",),
                vmem_limit_bytes=VMEM_LIMIT_BYTES),
        )(cls_tok, w_p, b_p)

        pooled = cls_tok
        logits = logits_p[:B, :L]

    elif pooling == "mean":
        itemsize = jnp.dtype(last_hidden.dtype).itemsize
        row_bytes = H * itemsize
        B8 = _round_up(B, 8)

        # Batch tile: up to 128 rows, halved (to >=2 tiles) so both v7x
        # TensorCores get work, then shrunk if an 8-row seq tile would already
        # blow the per-buffer byte budget.
        TB = min(B8, 128)
        if B8 >= 16:
            TB = min(TB, max(8, _round_up((B8 + 1) // 2, 8)))
        max_tb = max(8, (MEAN_TILE_BYTES // max(1, 8 * row_bytes)) // 8 * 8)
        TB = min(TB, max_tb)

        # Seq tile: fill the ~8 MiB per-buffer budget (HBM-bound path; bigger
        # tiles amortize the ~0.35 us per-step overhead).
        ts_cap = max(8, (MEAN_TILE_BYTES // max(1, TB * row_bytes)) // 8 * 8)
        TS = min(_round_up(S, 8), ts_cap)

        nb = pl.cdiv(B, TB)
        ns = pl.cdiv(S, TS)
        B_out = nb * TB
        mask_seq = (ns * TS != S)      # boundary-block garbage in the seq tail

        kernel = functools.partial(_mean_kernel, seq_len=S, block_seq=TS,
                                   mask_seq=mask_seq)
        pooled_p, logits_p = pl.pallas_call(
            kernel,
            out_shape=(jax.ShapeDtypeStruct((B_out, H), pooled_dtype),
                       jax.ShapeDtypeStruct((B_out, L_pad), logits_dtype)),
            grid_spec=pltpu.PrefetchScalarGridSpec(
                num_scalar_prefetch=0,
                grid=(nb, ns),
                in_specs=[
                    pl.BlockSpec((TB, TS, H), lambda i, s: (i, s, 0)),
                    pl.BlockSpec((H, L_pad), lambda i, s: (0, 0)),
                    pl.BlockSpec((1, L_pad), lambda i, s: (0, 0)),
                ],
                out_specs=[
                    pl.BlockSpec((TB, H), lambda i, s: (i, 0)),
                    pl.BlockSpec((TB, L_pad), lambda i, s: (i, 0)),
                ],
                scratch_shapes=[pltpu.VMEM((TB, H), jnp.float32)],
            ),
            compiler_params=pltpu.CompilerParams(
                dimension_semantics=("parallel", "arbitrary"),
                vmem_limit_bytes=VMEM_LIMIT_BYTES),
        )(last_hidden, w_p, b_p)

        # Rows >= B are boundary-block garbage; sliced off here (tiny arrays).
        pooled = pooled_p[:B, :]
        logits = logits_p[:B, :L]

    else:
        raise ValueError("pooling mode must be cls or mean")

    return {"hidden": pooled, "logits": logits}


# ---------------------------------------------------------------------------
# Self-test
# ---------------------------------------------------------------------------
if __name__ == "__main__":
    # Small shapes consistent with the module: batch=2, seq=8, hidden=32, labels=2.
    B, S, H, L = 2, 8, 32, 2
    key = jax.random.PRNGKey(0)
    k_hidden, k_w, k_b = jax.random.split(key, 3)

    last_hidden = jax.random.normal(k_hidden, (B, S, H), dtype=jnp.float32)
    w = (jax.random.normal(k_w, (H, L), dtype=jnp.float32)
         * (1.0 / jnp.sqrt(H)))                 # Linear weight (pre-transposed)
    b = jax.random.normal(k_b, (L,), dtype=jnp.float32) * 0.01

    # cls pooling
    out = pooled_lm_forward(last_hidden, w, b, pooling="cls")
    jax.block_until_ready(out["logits"])
    jax.block_until_ready(out["hidden"])
    ref_pooled = last_hidden[:, 0, :]
    ref_logits = ref_pooled @ w + b
    assert out["hidden"].shape == (B, H) and out["logits"].shape == (B, L)
    assert jnp.allclose(out["hidden"], ref_pooled, atol=1e-5, rtol=1e-5)
    assert jnp.allclose(out["logits"], ref_logits, atol=1e-5, rtol=1e-5)

    # mean pooling (divisible seq)
    out_m = pooled_lm_forward(last_hidden, w, b, pooling="mean")
    jax.block_until_ready(out_m["logits"])
    ref_pm = last_hidden.mean(axis=1)
    ref_lm = ref_pm @ w + b
    assert jnp.allclose(out_m["hidden"], ref_pm, atol=1e-5, rtol=1e-5)
    assert jnp.allclose(out_m["logits"], ref_lm, atol=1e-5, rtol=1e-5)

    # ragged batch/seq (exercises boundary-block handling + seq-tail mask)
    B2, S2 = 5, 13
    lh2 = jax.random.normal(k_hidden, (B2, S2, H), dtype=jnp.float32)
    out2 = pooled_lm_forward(lh2, w, b, pooling="mean")
    jax.block_until_ready(out2["logits"])
    ref_pm2 = lh2.mean(axis=1)
    ref_lm2 = ref_pm2 @ w + b
    assert out2["hidden"].shape == (B2, H) and out2["logits"].shape == (B2, L)
    assert jnp.allclose(out2["hidden"], ref_pm2, atol=1e-5, rtol=1e-5)
    assert jnp.allclose(out2["logits"], ref_lm2, atol=1e-5, rtol=1e-5)

    out3 = pooled_lm_forward(lh2, w, b, pooling="cls")
    jax.block_until_ready(out3["logits"])
    ref_lc2 = lh2[:, 0, :] @ w + b
    assert jnp.allclose(out3["logits"], ref_lc2, atol=1e-5, rtol=1e-5)

    print("KERNEL_OK")
</pallas_src>

<mosaic_0001>
module attributes {stable_mosaic.version = 11 : i64} {
  func.func @_cls_kernel(%arg0: i32, %arg1: memref<8x32xf32, #tpu.memory_space<vmem>>, %arg2: memref<32x128xf32, #tpu.memory_space<vmem>>, %arg3: memref<1x128xf32, #tpu.memory_space<vmem>>, %arg4: memref<8x128xf32, #tpu.memory_space<vmem>>) attributes {dimension_semantics = [#tpu.dimension_semantics<parallel>], iteration_bounds = array<i64: 1>, scalar_prefetch = 0 : i64, scratch_operands = 0 : i64, tpu.core_type = #tpu.core_type<tc>, window_params = [{transform_indices = @transform_0, window_bounds = array<i64: 8, 32>}, {pipeline_mode = #tpu.pipeline_mode<synchronous>, transform_indices = @transform_1, window_bounds = array<i64: 32, 128>}, {pipeline_mode = #tpu.pipeline_mode<synchronous>, transform_indices = @transform_2, window_bounds = array<i64: 1, 128>}, {transform_indices = @transform_3, window_bounds = array<i64: 8, 128>}]} {
    %c0 = arith.constant 0 : index
    %c0_0 = arith.constant 0 : index
    %0 = vector.load %arg1[%c0, %c0_0] : memref<8x32xf32, #tpu.memory_space<vmem>>, vector<8x32xf32>
    %c0_1 = arith.constant 0 : index
    %c0_2 = arith.constant 0 : index
    %1 = vector.load %arg2[%c0_1, %c0_2] : memref<32x128xf32, #tpu.memory_space<vmem>>, vector<32x128xf32>
    %cst = arith.constant dense<0.000000e+00> : vector<8x128xf32>
    %2 = tpu.matmul %0, %1, %cst {dimension_numbers = #tpu.dot_dimension_numbers<[1], [0], [0], [1], [0, 0, 1, 1], [], []>} : vector<8x32xf32>, vector<32x128xf32>, vector<8x128xf32> -> vector<8x128xf32>
    %c0_3 = arith.constant 0 : index
    %c0_4 = arith.constant 0 : index
    %3 = vector.load %arg3[%c0_3, %c0_4] : memref<1x128xf32, #tpu.memory_space<vmem>>, vector<1x128xf32>
    %4 = vector.broadcast %3 : vector<1x128xf32> to vector<8x128xf32>
    %5 = arith.addf %2, %4 : vector<8x128xf32>
    %c0_5 = arith.constant 0 : index
    %c0_6 = arith.constant 0 : index
    %6 = vector.load %arg4[%c0_5, %c0_6] : memref<8x128xf32, #tpu.memory_space<vmem>>, vector<8x128xf32>
    tpu.vector_store %arg4[%c0_5, %c0_6], %5 {strides = array<i32>} : memref<8x128xf32, #tpu.memory_space<vmem>>, vector<8x128xf32>,
    return
  }
  func.func @transform_0(%arg0: i32) -> (i32, i32) {
    %c0_i32 = arith.constant 0 : i32
    %c0_i32_0 = arith.constant 0 : i32
    return %arg0, %c0_i32 : i32, i32
  }
  func.func @transform_1(%arg0: i32) -> (i32, i32) {
    %c0_i32 = arith.constant 0 : i32
    %c0_i32_0 = arith.constant 0 : i32
    %c0_i32_1 = arith.constant 0 : i32
    return %c0_i32, %c0_i32_0 : i32, i32
  }
  func.func @transform_2(%arg0: i32) -> (i32, i32) {
    %c0_i32 = arith.constant 0 : i32
    %c0_i32_0 = arith.constant 0 : i32
    %c0_i32_1 = arith.constant 0 : i32
    return %c0_i32, %c0_i32_0 : i32, i32
  }
  func.func @transform_3(%arg0: i32) -> (i32, i32) {
    %c0_i32 = arith.constant 0 : i32
    %c0_i32_0 = arith.constant 0 : i32
    return %arg0, %c0_i32 : i32, i32
  }
}

</mosaic_0001>

<bundles_post_ra>
// kernel: tpu_custom_call.1
= control target key start
LH: loop header
LB: loop body
LE: loop exit
PB: predicated region body
PF: predicated region fallthrough
CT: control target
= control target key end

     0   :  { %8 = vsyncpa [#allocation3], 0  ;;  %s225_s0 = inlined_call_operand.hbm [shape: f32[2,32], index: 0, kind: input, shape index: {}]   ;;  %s226_s1 = inlined_call_operand.hbm [shape: f32[32,128], index: 1, kind: input, shape index: {}]   ;;  %s227_s2 = inlined_call_operand.vmem [shape: f32[1,128], index: 2, kind: input, shape index: {}]   ;;  %s228_s3 = inlined_call_operand.hbm [shape: f32[8,128], index: 3, kind: output, shape index: {}]  }
   0x1   :  { %9 = vsyncpa [#allocation6], 0 }
   0x2   :  { %10 = vsyncpa [#allocation4], 0 }
   0x3   :  { %14 = vsyncadd [#allocation3], 96  ;;  %s15_s14 = sshll.u32 %s225_s0, 4  ;;  %s186_s15 = smov [#allocation2]   ;;  %s16_s14 = int_to_ptr.hbm [resolvable:$true] %s15_s14 }
   0x4   :  { %s17_s16 = sshll.u32 %s186_s15, 4  ;;  %s28_s19 = sshll.u32 %s226_s1, 4  ;;  %s18_s16 = int_to_ptr.vmem [resolvable:$true] %s17_s16  ;;  %s29_s19 = int_to_ptr.hbm [resolvable:$true] %s28_s19 }
   0x5   :  { %s187_s20 = smov 32   ;;  %s188_s21 = smov 2  }
   0x6   :  { %23 = dma.hbm_to_vmem [thread:$0]  %s16_s14, 32, %s18_s16, [#allocation3], %s187_s20, %s187_s20, %s188_s21  }
   0x7   :  { %s189_s22 = smov [#allocation5]   ;;  %s190_s24 = smov 128  }
   0x8   :  { %s30_s23 = sshll.u32 %s189_s22, 4  ;;  %s191_s25 = smov 8   ;;  %s31_s23 = int_to_ptr.vmem [resolvable:$true] %s30_s23 }
   0x9   :  { %36 = dma.hbm_to_vmem [thread:$0]  %s29_s19, 512, %s31_s23, [#allocation6], %s190_s24, %s190_s24, %s191_s25  }
   0xa   :  { %180 = dma.done.wait [#allocation3], 128  }
   0xb   :  { %181 = vsyncadd [#allocation3], 4294967168 }
   0xc   :  { %182 = dma.done.wait [#allocation6], 512  }
   0xd   :  { %183 = vsyncadd [#allocation6], 4294966784  ;;  %v51_v0 = vld [vmem:[#allocation5 + $0x18] sm:$0xff]  ;;  %v50_v1 = vld [vmem:[#allocation5 + $0x10] sm:$0xff]  ;;  %vm56_vm0 = vcmask 261120   ;;  %s192_s26 = smov [#allocation7]  }
   0xe   :  { %72 = vmatpush.msra.mxu0 %v51_v0  ;;  %v49_v2 = vld [vmem:[#allocation5 + $0x8] sm:$0xff]  ;;  %v48_v3 = vld [vmem:[#allocation5] sm:$0xff]  ;;  %v47_v4 = vld [vmem:[#allocation2] sm:$0xff]  ;;  %s86_s27 = sshll.u32 %s192_s26, 4  ;;  %s88_s30 = sshll.u32 %s228_s3, 4  ;;  %s87_s27 = int_to_ptr.vmem [resolvable:$true] %s86_s27  ;;  %s89_s30 = int_to_ptr.hbm [resolvable:$true] %s88_s30 }
   0xf   :  { %v107_v5 = vld [vmem:[%s227_s2] ss:$0 sm:$0xff] }
  0x10   :  { %73 = vmatpush.msra.mxu0 %v50_v1 }
  0x12   :  { %74 = vmatpush.msra.mxu0 %v49_v2 }
  0x14   :  { %75 = vmatpush.msra.mxu0 %v48_v3 }
  0x15   :  { %99 = vmatmul.msk.f32.vlgmr.msra.gmra.mxu0 %vm56_vm0, %v47_v4 }
  0x92   :  { %v77_v6 = vpop.f32.mrf.mxu0 }
  0x93   :  { %v78_v7 = vadd.f32 %v107_v5, %v77_v6 }
  0x95   :  { %80 = vst [vmem:[#allocation7] sm:$0xff] %v78_v7 }
  0x96   :  { %91 = dma.vmem_to_hbm [thread:$0]  %s87_s27, 128, %s89_s30, [#allocation4]  }
  0x97   :  { %184 = dma.done.wait [#allocation4], 128  }
  0x98   :  { %185 = vsyncadd [#allocation4], 4294967168 }
  0x99   :  { %96 = vsyncpa [#allocation3], 1 }
  0x9a   :  { %97 = vsyncpa [#allocation6], 1 }
  0x9b   :  { %98 = vsyncpa [#allocation4], 1 }

</bundles_post_ra>
